<compile_context>
chip_gen: v6e
topology: v6e:2x2x1
jax: 0.10.0
libtpu: 0.0.40
codegen_flags: <defaults>
</compile_context>

<pallas_src>
import numpy as np
import jax
import jax.numpy as jnp
from jax import lax
from jax.experimental import pallas as pl
from jax.experimental.pallas import tpu as pltpu


# --------------------------------------------------------------------------
# Kernel factory (static shapes / tap tables are closed over)
# --------------------------------------------------------------------------
def _make_kernel(N, C, H, W, taps, updelta):
    H2, W2 = H // 2, W // 2
    HW4 = H2 * W2
    NC = N * C
    inv_count = 1.0 / float(N * H * W)
    eps = 1e-5

    def kernel(xph_ref, xcat_ref, wstack_ref, bias_ref, convmask_ref,
               upw_ref, grp_ref, gamma_ref, beta_ref, out_ref):
        f32 = jnp.float32

        def shift_cols(v, d):
            # out[:, p] = v[:, p + d] if 0 <= p + d < L else 0.
            # Static slice + concat (no MXU permutation matmuls, no dense
            # shift operators).  pltpu.roll would also work here.
            if d == 0:
                return v
            rows, L = v.shape
            if d > 0:
                zero = jnp.zeros((rows, d), f32)
                return jnp.concatenate([v[:, d:], zero], axis=1)
            zero = jnp.zeros((rows, -d), f32)
            return jnp.concatenate([zero, v[:, :L + d]], axis=1)

        # ---- MaxPool2d(2,2): elementwise max of the 4 stride-2 phases ------
        pooled = jnp.maximum(jnp.maximum(xph_ref[0], xph_ref[1]),
                             jnp.maximum(xph_ref[2], xph_ref[3]))   # (NC,HW4)

        # ---- Conv2d(C,C,3,padding=1): one fused bf16 channel-mix matmul ----
        g = jnp.dot(wstack_ref[...], pooled.astype(jnp.bfloat16),
                    preferred_element_type=f32)                     # (9NC,HW4)
        cmask = convmask_ref[...]                                   # (9,1,HW4)
        acc = jnp.zeros((NC, HW4), f32)
        for t, (dy, dx) in enumerate(taps):       # static 9-tap loop (VPU)
            gt = g[t * NC:(t + 1) * NC, :]
            acc = acc + shift_cols(gt, dy * W2 + dx) * cmask[t]
        conv = acc + bias_ref[...]                                  # (NC,HW4)

        # ---- bilinear x2 upsample (align_corners=False), per output phase --
        upw = upw_ref[...]                                          # (4,4,1,HW4)
        shifted = {}
        for p in range(4):
            for k in range(4):
                d = updelta[p][k]
                if d not in shifted:
                    shifted[d] = shift_cols(conv, d)
        atts = []
        for p in range(4):
            att = upw[p, 0] * shifted[updelta[p][0]]
            for k in range(1, 4):
                att = att + upw[p, k] * shifted[updelta[p][k]]
            atts.append(att)
        att_full = jnp.concatenate(atts, axis=1)                    # (NC,4*HW4)

        # ---- sigmoid gate + residual  (lane-dense (NC, H*W) from here on) --
        y = xcat_ref[...] * (jax.nn.sigmoid(att_full) + 1.0)

        # ---- BatchNorm2d (training-mode batch statistics) + ReLU -----------
        # TODO(synk): running_mean/running_var buffer updates (a training-mode
        # side effect that does not change the returned tensor) not emitted.
        row_sum = jnp.sum(y, axis=1, keepdims=True)                 # (NC,1)
        row_sq = jnp.sum(y * y, axis=1, keepdims=True)
        ch_sum = jnp.dot(grp_ref[...], row_sum,
                         preferred_element_type=f32)                # (NC,1)
        ch_sq = jnp.dot(grp_ref[...], row_sq,
                        preferred_element_type=f32)
        mean = ch_sum * inv_count
        var = ch_sq * inv_count - mean * mean
        inv_std = lax.rsqrt(var + eps)
        scale = gamma_ref[...] * inv_std            # hoisted: one FMA / elem
        shift = beta_ref[...] - mean * scale
        out_ref[...] = jnp.maximum(y * scale + shift, 0.0)

    return kernel


# --------------------------------------------------------------------------
# Small constant builders (plain numpy; all O(H*W) or O((N*C)^2) sized)
# --------------------------------------------------------------------------
def _build_operators(conv_w, conv_b, gamma, beta, N, C, H, W):
    H2, W2 = H // 2, W // 2
    HW4 = H2 * W2
    NC = N * C
    taps = [(dy, dx) for dy in (-1, 0, 1) for dx in (-1, 0, 1)]

    # Fused channel-mix weights: rows (tap, n, o), cols (n, i), block-diag in n.
    w = np.asarray(conv_w, np.float32)                       # (O, I, 3, 3)
    wstack = np.zeros((9 * NC, NC), np.float32)
    for t, (dy, dx) in enumerate(taps):
        for n in range(N):
            r0 = t * NC + n * C
            wstack[r0:r0 + C, n * C:(n + 1) * C] = w[:, :, dy + 1, dx + 1]

    # Conv zero-padding validity masks, one (1, HW4) plane per tap.
    u = np.arange(H2)[:, None]
    v = np.arange(W2)[None, :]
    convmask = np.zeros((9, 1, HW4), np.float32)
    for t, (dy, dx) in enumerate(taps):
        m = (u + dy >= 0) & (u + dy < H2) & (v + dx >= 0) & (v + dx < W2)
        convmask[t, 0] = m.astype(np.float32).reshape(HW4)

    # Bilinear x2 (align_corners=False) separable weights, clamping folded in.
    def axis_w(M):
        aw = np.zeros((2, 2, M), np.float32)
        idx = np.arange(M)
        aw[0, 0] = np.where(idx >= 1, 0.25, 0.0)       # out even, tap -1
        aw[0, 1] = np.where(idx >= 1, 0.75, 1.0)       # out even, tap  0
        aw[1, 0] = np.where(idx <= M - 2, 0.75, 1.0)   # out odd,  tap  0
        aw[1, 1] = np.where(idx <= M - 2, 0.25, 0.0)   # out odd,  tap +1
        return aw

    offs = ((-1, 0), (0, 1))
    wh, ww = axis_w(H2), axis_w(W2)
    upw = np.zeros((4, 4, 1, HW4), np.float32)
    updelta = [[0] * 4 for _ in range(4)]
    for r in range(2):
        for s in range(2):
            p = 2 * r + s
            for ka in range(2):
                for kb in range(2):
                    k = 2 * ka + kb
                    upw[p, k, 0] = np.outer(wh[r, ka], ww[s, kb]).reshape(HW4)
                    updelta[p][k] = offs[r][ka] * W2 + offs[s][kb]

    bias_r = np.tile(np.asarray(conv_b, np.float32), N).reshape(NC, 1)
    gamma_r = np.tile(np.asarray(gamma, np.float32), N).reshape(NC, 1)
    beta_r = np.tile(np.asarray(beta, np.float32), N).reshape(NC, 1)
    grp = (np.arange(NC)[:, None] % C ==
           np.arange(NC)[None, :] % C).astype(np.float32)   # channel group sum
    return taps, wstack, convmask, upw, updelta, bias_r, gamma_r, beta_r, grp


# --------------------------------------------------------------------------
# Wrapper
# --------------------------------------------------------------------------
def basic_attention_block(x, conv_w, conv_b, gamma, beta):
    N, C, H, W = x.shape
    assert H % 2 == 0 and W % 2 == 0, "even spatial size required (x2 up/down)"
    H2, W2 = H // 2, W // 2
    HW4 = H2 * W2
    NC = N * C

    (taps, wstack, convmask, upw, updelta,
     bias_r, gamma_r, beta_r, grp) = _build_operators(conv_w, conv_b, gamma,
                                                      beta, N, C, H, W)

    # Wrapper-side layout plumbing (zero FLOPs): stride-2 phase views of x.
    xf = jnp.asarray(x, jnp.float32)
    x6 = xf.reshape(N, C, H2, 2, W2, 2)                       # (n,c,u,r,v,s)
    xph = jnp.transpose(x6, (3, 5, 0, 1, 2, 4)).reshape(4, NC, HW4)
    xcat = jnp.transpose(xph, (1, 0, 2)).reshape(NC, 4 * HW4)  # lane-dense x

    kernel = _make_kernel(N, C, H, W, taps, updelta)

    operands = (xph, xcat,
                jnp.asarray(wstack, jnp.bfloat16),    # bf16 MXU operands
                jnp.asarray(bias_r), jnp.asarray(convmask),
                jnp.asarray(upw), jnp.asarray(grp),
                jnp.asarray(gamma_r), jnp.asarray(beta_r))

    def _spec(shape):
        nd = len(shape)
        return pl.BlockSpec(shape, lambda i, _nd=nd: (0,) * _nd)

    out_flat = pl.pallas_call(
        kernel,
        out_shape=jax.ShapeDtypeStruct((NC, 4 * HW4), jnp.float32),
        grid=(1,),
        in_specs=[_spec(op.shape) for op in operands],
        out_specs=_spec((NC, 4 * HW4)),
        compiler_params=pltpu.CompilerParams(
            dimension_semantics=("arbitrary",)),
    )(*operands)

    # De-interleave the 4 output phases back to NCHW (pure layout).
    out6 = out_flat.reshape(N, C, 2, 2, H2, W2)               # (n,c,r,s,u,v)
    return jnp.transpose(out6, (0, 1, 4, 2, 5, 3)).reshape(N, C, H, W)


# --------------------------------------------------------------------------
# Pure-JAX reference (for verification only)
# --------------------------------------------------------------------------
def reference_forward(x, conv_w, conv_b, gamma, beta, eps=1e-5):
    N, C, H, W = x.shape
    identity = x
    p = x.reshape(N, C, H // 2, 2, W // 2, 2).max(axis=(3, 5))
    c = lax.conv_general_dilated(
        p, conv_w, window_strides=(1, 1), padding="SAME",
        dimension_numbers=("NCHW", "OIHW", "NCHW")) + conv_b.reshape(1, C, 1, 1)

    def interp_idx(n_out, n_in):
        i = np.arange(n_out)
        src = np.maximum((i + 0.5) * (n_in / n_out) - 0.5, 0.0)
        i0 = np.minimum(np.floor(src).astype(np.int32), n_in - 1)
        i1 = np.minimum(i0 + 1, n_in - 1)
        w1 = (src - i0).astype(np.float32)
        return i0, i1, (1.0 - w1), w1

    h0, h1, wh0, wh1 = interp_idx(H, H // 2)
    v0, v1, wv0, wv1 = interp_idx(W, W // 2)
    rh = (c[:, :, h0, :] * wh0[None, None, :, None]
          + c[:, :, h1, :] * wh1[None, None, :, None])
    up = (rh[:, :, :, v0] * wv0[None, None, None, :]
          + rh[:, :, :, v1] * wv1[None, None, None, :])
    sig = jax.nn.sigmoid(up)
    y = identity * sig + identity
    mean = y.mean(axis=(0, 2, 3), keepdims=True)
    var = jnp.mean((y - mean) ** 2, axis=(0, 2, 3), keepdims=True)
    out = ((y - mean) / jnp.sqrt(var + eps) * gamma.reshape(1, C, 1, 1)
           + beta.reshape(1, C, 1, 1))
    return jnp.maximum(out, 0.0)


# --------------------------------------------------------------------------
if __name__ == "__main__":
    key = jax.random.PRNGKey(0)
    kx, kw, kb, kg, kbt = jax.random.split(key, 5)

    N, C, H, W = 2, 4, 16, 16
    x = jax.random.normal(kx, (N, C, H, W), jnp.float32)
    conv_w = 0.2 * jax.random.normal(kw, (C, C, 3, 3), jnp.float32)
    conv_b = 0.1 * jax.random.normal(kb, (C,), jnp.float32)
    gamma = 1.0 + 0.1 * jax.random.normal(kg, (C,), jnp.float32)
    beta = 0.1 * jax.random.normal(kbt, (C,), jnp.float32)

    out = basic_attention_block(x, conv_w, conv_b, gamma, beta)
    out = jax.block_until_ready(out)

    ref = reference_forward(x, conv_w, conv_b, gamma, beta)
    # tolerance absorbs the bf16 matmul operands
    np.testing.assert_allclose(np.asarray(out), np.asarray(ref),
                               rtol=3e-2, atol=3e-2)
    print("KERNEL_OK")
</pallas_src>

<mosaic_0001>
module attributes {stable_mosaic.version = 11 : i64} {
  func.func @kernel(%arg0: i32, %arg1: memref<4x8x64xf32, #tpu.memory_space<vmem>>, %arg2: memref<8x256xf32, #tpu.memory_space<vmem>>, %arg3: memref<72x8xbf16, #tpu.memory_space<vmem>>, %arg4: memref<8x1xf32, #tpu.memory_space<vmem>>, %arg5: memref<9x1x64xf32, #tpu.memory_space<vmem>>, %arg6: memref<4x4x1x64xf32, #tpu.memory_space<vmem>>, %arg7: memref<8x8xf32, #tpu.memory_space<vmem>>, %arg8: memref<8x1xf32, #tpu.memory_space<vmem>>, %arg9: memref<8x1xf32, #tpu.memory_space<vmem>>, %arg10: memref<8x256xf32, #tpu.memory_space<vmem>>) attributes {dimension_semantics = [#tpu.dimension_semantics<arbitrary>], iteration_bounds = array<i64: 1>, scalar_prefetch = 0 : i64, scratch_operands = 0 : i64, tpu.core_type = #tpu.core_type<tc>, window_params = [{pipeline_mode = #tpu.pipeline_mode<synchronous>, transform_indices = @transform_0, window_bounds = array<i64: 4, 8, 64>}, {pipeline_mode = #tpu.pipeline_mode<synchronous>, transform_indices = @transform_1, window_bounds = array<i64: 8, 256>}, {pipeline_mode = #tpu.pipeline_mode<synchronous>, transform_indices = @transform_2, window_bounds = array<i64: 72, 8>}, {pipeline_mode = #tpu.pipeline_mode<synchronous>, transform_indices = @transform_3, window_bounds = array<i64: 8, 1>}, {pipeline_mode = #tpu.pipeline_mode<synchronous>, transform_indices = @transform_4, window_bounds = array<i64: 9, 1, 64>}, {pipeline_mode = #tpu.pipeline_mode<synchronous>, transform_indices = @transform_5, window_bounds = array<i64: 4, 4, 1, 64>}, {pipeline_mode = #tpu.pipeline_mode<synchronous>, transform_indices = @transform_6, window_bounds = array<i64: 8, 8>}, {pipeline_mode = #tpu.pipeline_mode<synchronous>, transform_indices = @transform_7, window_bounds = array<i64: 8, 1>}, {pipeline_mode = #tpu.pipeline_mode<synchronous>, transform_indices = @transform_8, window_bounds = array<i64: 8, 1>}, {pipeline_mode = #tpu.pipeline_mode<synchronous>, transform_indices = @transform_9, window_bounds = array<i64: 8, 256>}]} {
    %c0 = arith.constant 0 : index
    %c0_0 = arith.constant 0 : index
    %c0_1 = arith.constant 0 : index
    %0 = vector.load %arg1[%c0, %c0_0, %c0_1] : memref<4x8x64xf32, #tpu.memory_space<vmem>>, vector<1x8x64xf32>
    %1 = vector.shape_cast %0 : vector<1x8x64xf32> to vector<8x64xf32>
    %c1 = arith.constant 1 : index
    %c0_2 = arith.constant 0 : index
    %c0_3 = arith.constant 0 : index
    %2 = vector.load %arg1[%c1, %c0_2, %c0_3] : memref<4x8x64xf32, #tpu.memory_space<vmem>>, vector<1x8x64xf32>
    %3 = vector.shape_cast %2 : vector<1x8x64xf32> to vector<8x64xf32>
    %4 = arith.maximumf %1, %3 : vector<8x64xf32>
    %c2 = arith.constant 2 : index
    %c0_4 = arith.constant 0 : index
    %c0_5 = arith.constant 0 : index
    %5 = vector.load %arg1[%c2, %c0_4, %c0_5] : memref<4x8x64xf32, #tpu.memory_space<vmem>>, vector<1x8x64xf32>
    %6 = vector.shape_cast %5 : vector<1x8x64xf32> to vector<8x64xf32>
    %c3 = arith.constant 3 : index
    %c0_6 = arith.constant 0 : index
    %c0_7 = arith.constant 0 : index
    %7 = vector.load %arg1[%c3, %c0_6, %c0_7] : memref<4x8x64xf32, #tpu.memory_space<vmem>>, vector<1x8x64xf32>
    %8 = vector.shape_cast %7 : vector<1x8x64xf32> to vector<8x64xf32>
    %9 = arith.maximumf %6, %8 : vector<8x64xf32>
    %10 = arith.maximumf %4, %9 : vector<8x64xf32>
    %c0_8 = arith.constant 0 : index
    %c0_9 = arith.constant 0 : index
    %11 = vector.load %arg3[%c0_8, %c0_9] : memref<72x8xbf16, #tpu.memory_space<vmem>>, vector<72x8xbf16>
    %12 = arith.truncf %10 : vector<8x64xf32> to vector<8x64xbf16>
    %cst = arith.constant dense<0.000000e+00> : vector<72x64xf32>
    %13 = tpu.matmul %11, %12, %cst {dimension_numbers = #tpu.dot_dimension_numbers<[1], [0], [0], [1], [0, 0, 1, 1], [], []>} : vector<72x8xbf16>, vector<8x64xbf16>, vector<72x64xf32> -> vector<72x64xf32>
    %c0_10 = arith.constant 0 : index
    %c0_11 = arith.constant 0 : index
    %c0_12 = arith.constant 0 : index
    %14 = vector.load %arg5[%c0_10, %c0_11, %c0_12] : memref<9x1x64xf32, #tpu.memory_space<vmem>>, vector<9x1x64xf32>
    %cst_13 = arith.constant 0.000000e+00 : f32
    %15 = vector.broadcast %cst_13 : f32 to vector<8x64xf32>
    %16 = vector.extract_strided_slice %13 {offsets = [0, 0], sizes = [8, 64], strides = [1, 1]} : vector<72x64xf32> to vector<8x64xf32>
    %cst_14 = arith.constant 0.000000e+00 : f32
    %17 = vector.broadcast %cst_14 : f32 to vector<8x9xf32>
    %18 = vector.extract_strided_slice %16 {offsets = [0, 0], sizes = [8, 55], strides = [1, 1]} : vector<8x64xf32> to vector<8x55xf32>
    %19 = tpu.concatenate %17, %18 in 1 : vector<8x9xf32>, vector<8x55xf32> -> vector<8x64xf32>
    %20 = vector.extract_strided_slice %14 {offsets = [0, 0, 0], sizes = [1, 1, 64], strides = [1, 1, 1]} : vector<9x1x64xf32> to vector<1x1x64xf32>
    %21 = vector.shape_cast %20 : vector<1x1x64xf32> to vector<1x64xf32>
    %22 = vector.broadcast %21 : vector<1x64xf32> to vector<8x64xf32>
    %23 = arith.mulf %19, %22 : vector<8x64xf32>
    %24 = arith.addf %15, %23 : vector<8x64xf32>
    %25 = vector.extract_strided_slice %13 {offsets = [8, 0], sizes = [8, 64], strides = [1, 1]} : vector<72x64xf32> to vector<8x64xf32>
    %cst_15 = arith.constant 0.000000e+00 : f32
    %26 = vector.broadcast %cst_15 : f32 to vector<8x8xf32>
    %27 = vector.extract_strided_slice %25 {offsets = [0, 0], sizes = [8, 56], strides = [1, 1]} : vector<8x64xf32> to vector<8x56xf32>
    %28 = tpu.concatenate %26, %27 in 1 : vector<8x8xf32>, vector<8x56xf32> -> vector<8x64xf32>
    %29 = vector.extract_strided_slice %14 {offsets = [1, 0, 0], sizes = [1, 1, 64], strides = [1, 1, 1]} : vector<9x1x64xf32> to vector<1x1x64xf32>
    %30 = vector.shape_cast %29 : vector<1x1x64xf32> to vector<1x64xf32>
    %31 = vector.broadcast %30 : vector<1x64xf32> to vector<8x64xf32>
    %32 = arith.mulf %28, %31 : vector<8x64xf32>
    %33 = arith.addf %24, %32 : vector<8x64xf32>
    %34 = vector.extract_strided_slice %13 {offsets = [16, 0], sizes = [8, 64], strides = [1, 1]} : vector<72x64xf32> to vector<8x64xf32>
    %cst_16 = arith.constant 0.000000e+00 : f32
    %35 = vector.broadcast %cst_16 : f32 to vector<8x7xf32>
    %36 = vector.extract_strided_slice %34 {offsets = [0, 0], sizes = [8, 57], strides = [1, 1]} : vector<8x64xf32> to vector<8x57xf32>
    %37 = tpu.concatenate %35, %36 in 1 : vector<8x7xf32>, vector<8x57xf32> -> vector<8x64xf32>
    %38 = vector.extract_strided_slice %14 {offsets = [2, 0, 0], sizes = [1, 1, 64], strides = [1, 1, 1]} : vector<9x1x64xf32> to vector<1x1x64xf32>
    %39 = vector.shape_cast %38 : vector<1x1x64xf32> to vector<1x64xf32>
    %40 = vector.broadcast %39 : vector<1x64xf32> to vector<8x64xf32>
    %41 = arith.mulf %37, %40 : vector<8x64xf32>
    %42 = arith.addf %33, %41 : vector<8x64xf32>
    %43 = vector.extract_strided_slice %13 {offsets = [24, 0], sizes = [8, 64], strides = [1, 1]} : vector<72x64xf32> to vector<8x64xf32>
    %cst_17 = arith.constant 0.000000e+00 : f32
    %44 = vector.broadcast %cst_17 : f32 to vector<8x1xf32>
    %45 = vector.extract_strided_slice %43 {offsets = [0, 0], sizes = [8, 63], strides = [1, 1]} : vector<8x64xf32> to vector<8x63xf32>
    %46 = tpu.concatenate %44, %45 in 1 : vector<8x1xf32>, vector<8x63xf32> -> vector<8x64xf32>
    %47 = vector.extract_strided_slice %14 {offsets = [3, 0, 0], sizes = [1, 1, 64], strides = [1, 1, 1]} : vector<9x1x64xf32> to vector<1x1x64xf32>
    %48 = vector.shape_cast %47 : vector<1x1x64xf32> to vector<1x64xf32>
    %49 = vector.broadcast %48 : vector<1x64xf32> to vector<8x64xf32>
    %50 = arith.mulf %46, %49 : vector<8x64xf32>
    %51 = arith.addf %42, %50 : vector<8x64xf32>
    %52 = vector.extract_strided_slice %13 {offsets = [32, 0], sizes = [8, 64], strides = [1, 1]} : vector<72x64xf32> to vector<8x64xf32>
    %53 = vector.extract_strided_slice %14 {offsets = [4, 0, 0], sizes = [1, 1, 64], strides = [1, 1, 1]} : vector<9x1x64xf32> to vector<1x1x64xf32>
    %54 = vector.shape_cast %53 : vector<1x1x64xf32> to vector<1x64xf32>
    %55 = vector.broadcast %54 : vector<1x64xf32> to vector<8x64xf32>
    %56 = arith.mulf %52, %55 : vector<8x64xf32>
    %57 = arith.addf %51, %56 : vector<8x64xf32>
    %58 = vector.extract_strided_slice %13 {offsets = [40, 0], sizes = [8, 64], strides = [1, 1]} : vector<72x64xf32> to vector<8x64xf32>
    %cst_18 = arith.constant 0.000000e+00 : f32
    %59 = vector.broadcast %cst_18 : f32 to vector<8x1xf32>
    %60 = vector.extract_strided_slice %58 {offsets = [0, 1], sizes = [8, 63], strides = [1, 1]} : vector<8x64xf32> to vector<8x63xf32>
    %61 = tpu.concatenate %60, %59 in 1 : vector<8x63xf32>, vector<8x1xf32> -> vector<8x64xf32>
    %62 = vector.extract_strided_slice %14 {offsets = [5, 0, 0], sizes = [1, 1, 64], strides = [1, 1, 1]} : vector<9x1x64xf32> to vector<1x1x64xf32>
    %63 = vector.shape_cast %62 : vector<1x1x64xf32> to vector<1x64xf32>
    %64 = vector.broadcast %63 : vector<1x64xf32> to vector<8x64xf32>
    %65 = arith.mulf %61, %64 : vector<8x64xf32>
    %66 = arith.addf %57, %65 : vector<8x64xf32>
    %67 = vector.extract_strided_slice %13 {offsets = [48, 0], sizes = [8, 64], strides = [1, 1]} : vector<72x64xf32> to vector<8x64xf32>
    %cst_19 = arith.constant 0.000000e+00 : f32
    %68 = vector.broadcast %cst_19 : f32 to vector<8x7xf32>
    %69 = vector.extract_strided_slice %67 {offsets = [0, 7], sizes = [8, 57], strides = [1, 1]} : vector<8x64xf32> to vector<8x57xf32>
    %70 = tpu.concatenate %69, %68 in 1 : vector<8x57xf32>, vector<8x7xf32> -> vector<8x64xf32>
    %71 = vector.extract_strided_slice %14 {offsets = [6, 0, 0], sizes = [1, 1, 64], strides = [1, 1, 1]} : vector<9x1x64xf32> to vector<1x1x64xf32>
    %72 = vector.shape_cast %71 : vector<1x1x64xf32> to vector<1x64xf32>
    %73 = vector.broadcast %72 : vector<1x64xf32> to vector<8x64xf32>
    %74 = arith.mulf %70, %73 : vector<8x64xf32>
    %75 = arith.addf %66, %74 : vector<8x64xf32>
    %76 = vector.extract_strided_slice %13 {offsets = [56, 0], sizes = [8, 64], strides = [1, 1]} : vector<72x64xf32> to vector<8x64xf32>
    %cst_20 = arith.constant 0.000000e+00 : f32
    %77 = vector.broadcast %cst_20 : f32 to vector<8x8xf32>
    %78 = vector.extract_strided_slice %76 {offsets = [0, 8], sizes = [8, 56], strides = [1, 1]} : vector<8x64xf32> to vector<8x56xf32>
    %79 = tpu.concatenate %78, %77 in 1 : vector<8x56xf32>, vector<8x8xf32> -> vector<8x64xf32>
    %80 = vector.extract_strided_slice %14 {offsets = [7, 0, 0], sizes = [1, 1, 64], strides = [1, 1, 1]} : vector<9x1x64xf32> to vector<1x1x64xf32>
    %81 = vector.shape_cast %80 : vector<1x1x64xf32> to vector<1x64xf32>
    %82 = vector.broadcast %81 : vector<1x64xf32> to vector<8x64xf32>
    %83 = arith.mulf %79, %82 : vector<8x64xf32>
    %84 = arith.addf %75, %83 : vector<8x64xf32>
    %85 = vector.extract_strided_slice %13 {offsets = [64, 0], sizes = [8, 64], strides = [1, 1]} : vector<72x64xf32> to vector<8x64xf32>
    %cst_21 = arith.constant 0.000000e+00 : f32
    %86 = vector.broadcast %cst_21 : f32 to vector<8x9xf32>
    %87 = vector.extract_strided_slice %85 {offsets = [0, 9], sizes = [8, 55], strides = [1, 1]} : vector<8x64xf32> to vector<8x55xf32>
    %88 = tpu.concatenate %87, %86 in 1 : vector<8x55xf32>, vector<8x9xf32> -> vector<8x64xf32>
    %89 = vector.extract_strided_slice %14 {offsets = [8, 0, 0], sizes = [1, 1, 64], strides = [1, 1, 1]} : vector<9x1x64xf32> to vector<1x1x64xf32>
    %90 = vector.shape_cast %89 : vector<1x1x64xf32> to vector<1x64xf32>
    %91 = vector.broadcast %90 : vector<1x64xf32> to vector<8x64xf32>
    %92 = arith.mulf %88, %91 : vector<8x64xf32>
    %93 = arith.addf %84, %92 : vector<8x64xf32>
    %c0_22 = arith.constant 0 : index
    %c0_23 = arith.constant 0 : index
    %94 = vector.load %arg4[%c0_22, %c0_23] : memref<8x1xf32, #tpu.memory_space<vmem>>, vector<8x1xf32>
    %95 = vector.broadcast %94 : vector<8x1xf32> to vector<8x64xf32>
    %96 = arith.addf %93, %95 : vector<8x64xf32>
    %c0_24 = arith.constant 0 : index
    %c0_25 = arith.constant 0 : index
    %c0_26 = arith.constant 0 : index
    %c0_27 = arith.constant 0 : index
    %97 = vector.load %arg6[%c0_24, %c0_25, %c0_26, %c0_27] : memref<4x4x1x64xf32, #tpu.memory_space<vmem>>, vector<4x4x1x64xf32>
    %cst_28 = arith.constant 0.000000e+00 : f32
    %98 = vector.broadcast %cst_28 : f32 to vector<8x9xf32>
    %99 = vector.extract_strided_slice %96 {offsets = [0, 0], sizes = [8, 55], strides = [1, 1]} : vector<8x64xf32> to vector<8x55xf32>
    %100 = tpu.concatenate %98, %99 in 1 : vector<8x9xf32>, vector<8x55xf32> -> vector<8x64xf32>
    %cst_29 = arith.constant 0.000000e+00 : f32
    %101 = vector.broadcast %cst_29 : f32 to vector<8x8xf32>
    %102 = vector.extract_strided_slice %96 {offsets = [0, 0], sizes = [8, 56], strides = [1, 1]} : vector<8x64xf32> to vector<8x56xf32>
    %103 = tpu.concatenate %101, %102 in 1 : vector<8x8xf32>, vector<8x56xf32> -> vector<8x64xf32>
    %cst_30 = arith.constant 0.000000e+00 : f32
    %104 = vector.broadcast %cst_30 : f32 to vector<8x1xf32>
    %105 = vector.extract_strided_slice %96 {offsets = [0, 0], sizes = [8, 63], strides = [1, 1]} : vector<8x64xf32> to vector<8x63xf32>
    %106 = tpu.concatenate %104, %105 in 1 : vector<8x1xf32>, vector<8x63xf32> -> vector<8x64xf32>
    %cst_31 = arith.constant 0.000000e+00 : f32
    %107 = vector.broadcast %cst_31 : f32 to vector<8x7xf32>
    %108 = vector.extract_strided_slice %96 {offsets = [0, 0], sizes = [8, 57], strides = [1, 1]} : vector<8x64xf32> to vector<8x57xf32>
    %109 = tpu.concatenate %107, %108 in 1 : vector<8x7xf32>, vector<8x57xf32> -> vector<8x64xf32>
    %cst_32 = arith.constant 0.000000e+00 : f32
    %110 = vector.broadcast %cst_32 : f32 to vector<8x1xf32>
    %111 = vector.extract_strided_slice %96 {offsets = [0, 1], sizes = [8, 63], strides = [1, 1]} : vector<8x64xf32> to vector<8x63xf32>
    %112 = tpu.concatenate %111, %110 in 1 : vector<8x63xf32>, vector<8x1xf32> -> vector<8x64xf32>
    %cst_33 = arith.constant 0.000000e+00 : f32
    %113 = vector.broadcast %cst_33 : f32 to vector<8x7xf32>
    %114 = vector.extract_strided_slice %96 {offsets = [0, 7], sizes = [8, 57], strides = [1, 1]} : vector<8x64xf32> to vector<8x57xf32>
    %115 = tpu.concatenate %114, %113 in 1 : vector<8x57xf32>, vector<8x7xf32> -> vector<8x64xf32>
    %cst_34 = arith.constant 0.000000e+00 : f32
    %116 = vector.broadcast %cst_34 : f32 to vector<8x8xf32>
    %117 = vector.extract_strided_slice %96 {offsets = [0, 8], sizes = [8, 56], strides = [1, 1]} : vector<8x64xf32> to vector<8x56xf32>
    %118 = tpu.concatenate %117, %116 in 1 : vector<8x56xf32>, vector<8x8xf32> -> vector<8x64xf32>
    %cst_35 = arith.constant 0.000000e+00 : f32
    %119 = vector.broadcast %cst_35 : f32 to vector<8x9xf32>
    %120 = vector.extract_strided_slice %96 {offsets = [0, 9], sizes = [8, 55], strides = [1, 1]} : vector<8x64xf32> to vector<8x55xf32>
    %121 = tpu.concatenate %120, %119 in 1 : vector<8x55xf32>, vector<8x9xf32> -> vector<8x64xf32>
    %122 = vector.extract_strided_slice %97 {offsets = [0, 0, 0, 0], sizes = [1, 1, 1, 64], strides = [1, 1, 1, 1]} : vector<4x4x1x64xf32> to vector<1x1x1x64xf32>
    %123 = vector.shape_cast %122 : vector<1x1x1x64xf32> to vector<1x64xf32>
    %124 = vector.broadcast %123 : vector<1x64xf32> to vector<8x64xf32>
    %125 = arith.mulf %124, %100 : vector<8x64xf32>
    %126 = vector.extract_strided_slice %97 {offsets = [0, 1, 0, 0], sizes = [1, 1, 1, 64], strides = [1, 1, 1, 1]} : vector<4x4x1x64xf32> to vector<1x1x1x64xf32>
    %127 = vector.shape_cast %126 : vector<1x1x1x64xf32> to vector<1x64xf32>
    %128 = vector.broadcast %127 : vector<1x64xf32> to vector<8x64xf32>
    %129 = arith.mulf %128, %103 : vector<8x64xf32>
    %130 = arith.addf %125, %129 : vector<8x64xf32>
    %131 = vector.extract_strided_slice %97 {offsets = [0, 2, 0, 0], sizes = [1, 1, 1, 64], strides = [1, 1, 1, 1]} : vector<4x4x1x64xf32> to vector<1x1x1x64xf32>
    %132 = vector.shape_cast %131 : vector<1x1x1x64xf32> to vector<1x64xf32>
    %133 = vector.broadcast %132 : vector<1x64xf32> to vector<8x64xf32>
    %134 = arith.mulf %133, %106 : vector<8x64xf32>
    %135 = arith.addf %130, %134 : vector<8x64xf32>
    %136 = vector.extract_strided_slice %97 {offsets = [0, 3, 0, 0], sizes = [1, 1, 1, 64], strides = [1, 1, 1, 1]} : vector<4x4x1x64xf32> to vector<1x1x1x64xf32>
    %137 = vector.shape_cast %136 : vector<1x1x1x64xf32> to vector<1x64xf32>
    %138 = vector.broadcast %137 : vector<1x64xf32> to vector<8x64xf32>
    %139 = arith.mulf %138, %96 : vector<8x64xf32>
    %140 = arith.addf %135, %139 : vector<8x64xf32>
    %141 = vector.extract_strided_slice %97 {offsets = [1, 0, 0, 0], sizes = [1, 1, 1, 64], strides = [1, 1, 1, 1]} : vector<4x4x1x64xf32> to vector<1x1x1x64xf32>
    %142 = vector.shape_cast %141 : vector<1x1x1x64xf32> to vector<1x64xf32>
    %143 = vector.broadcast %142 : vector<1x64xf32> to vector<8x64xf32>
    %144 = arith.mulf %143, %103 : vector<8x64xf32>
    %145 = vector.extract_strided_slice %97 {offsets = [1, 1, 0, 0], sizes = [1, 1, 1, 64], strides = [1, 1, 1, 1]} : vector<4x4x1x64xf32> to vector<1x1x1x64xf32>
    %146 = vector.shape_cast %145 : vector<1x1x1x64xf32> to vector<1x64xf32>
    %147 = vector.broadcast %146 : vector<1x64xf32> to vector<8x64xf32>
    %148 = arith.mulf %147, %109 : vector<8x64xf32>
    %149 = arith.addf %144, %148 : vector<8x64xf32>
    %150 = vector.extract_strided_slice %97 {offsets = [1, 2, 0, 0], sizes = [1, 1, 1, 64], strides = [1, 1, 1, 1]} : vector<4x4x1x64xf32> to vector<1x1x1x64xf32>
    %151 = vector.shape_cast %150 : vector<1x1x1x64xf32> to vector<1x64xf32>
    %152 = vector.broadcast %151 : vector<1x64xf32> to vector<8x64xf32>
    %153 = arith.mulf %152, %96 : vector<8x64xf32>
    %154 = arith.addf %149, %153 : vector<8x64xf32>
    %155 = vector.extract_strided_slice %97 {offsets = [1, 3, 0, 0], sizes = [1, 1, 1, 64], strides = [1, 1, 1, 1]} : vector<4x4x1x64xf32> to vector<1x1x1x64xf32>
    %156 = vector.shape_cast %155 : vector<1x1x1x64xf32> to vector<1x64xf32>
    %157 = vector.broadcast %156 : vector<1x64xf32> to vector<8x64xf32>
    %158 = arith.mulf %157, %112 : vector<8x64xf32>
    %159 = arith.addf %154, %158 : vector<8x64xf32>
    %160 = vector.extract_strided_slice %97 {offsets = [2, 0, 0, 0], sizes = [1, 1, 1, 64], strides = [1, 1, 1, 1]} : vector<4x4x1x64xf32> to vector<1x1x1x64xf32>
    %161 = vector.shape_cast %160 : vector<1x1x1x64xf32> to vector<1x64xf32>
    %162 = vector.broadcast %161 : vector<1x64xf32> to vector<8x64xf32>
    %163 = arith.mulf %162, %106 : vector<8x64xf32>
    %164 = vector.extract_strided_slice %97 {offsets = [2, 1, 0, 0], sizes = [1, 1, 1, 64], strides = [1, 1, 1, 1]} : vector<4x4x1x64xf32> to vector<1x1x1x64xf32>
    %165 = vector.shape_cast %164 : vector<1x1x1x64xf32> to vector<1x64xf32>
    %166 = vector.broadcast %165 : vector<1x64xf32> to vector<8x64xf32>
    %167 = arith.mulf %166, %96 : vector<8x64xf32>
    %168 = arith.addf %163, %167 : vector<8x64xf32>
    %169 = vector.extract_strided_slice %97 {offsets = [2, 2, 0, 0], sizes = [1, 1, 1, 64], strides = [1, 1, 1, 1]} : vector<4x4x1x64xf32> to vector<1x1x1x64xf32>
    %170 = vector.shape_cast %169 : vector<1x1x1x64xf32> to vector<1x64xf32>
    %171 = vector.broadcast %170 : vector<1x64xf32> to vector<8x64xf32>
    %172 = arith.mulf %171, %115 : vector<8x64xf32>
    %173 = arith.addf %168, %172 : vector<8x64xf32>
    %174 = vector.extract_strided_slice %97 {offsets = [2, 3, 0, 0], sizes = [1, 1, 1, 64], strides = [1, 1, 1, 1]} : vector<4x4x1x64xf32> to vector<1x1x1x64xf32>
    %175 = vector.shape_cast %174 : vector<1x1x1x64xf32> to vector<1x64xf32>
    %176 = vector.broadcast %175 : vector<1x64xf32> to vector<8x64xf32>
    %177 = arith.mulf %176, %118 : vector<8x64xf32>
    %178 = arith.addf %173, %177 : vector<8x64xf32>
    %179 = vector.extract_strided_slice %97 {offsets = [3, 0, 0, 0], sizes = [1, 1, 1, 64], strides = [1, 1, 1, 1]} : vector<4x4x1x64xf32> to vector<1x1x1x64xf32>
    %180 = vector.shape_cast %179 : vector<1x1x1x64xf32> to vector<1x64xf32>
    %181 = vector.broadcast %180 : vector<1x64xf32> to vector<8x64xf32>
    %182 = arith.mulf %181, %96 : vector<8x64xf32>
    %183 = vector.extract_strided_slice %97 {offsets = [3, 1, 0, 0], sizes = [1, 1, 1, 64], strides = [1, 1, 1, 1]} : vector<4x4x1x64xf32> to vector<1x1x1x64xf32>
    %184 = vector.shape_cast %183 : vector<1x1x1x64xf32> to vector<1x64xf32>
    %185 = vector.broadcast %184 : vector<1x64xf32> to vector<8x64xf32>
    %186 = arith.mulf %185, %112 : vector<8x64xf32>
    %187 = arith.addf %182, %186 : vector<8x64xf32>
    %188 = vector.extract_strided_slice %97 {offsets = [3, 2, 0, 0], sizes = [1, 1, 1, 64], strides = [1, 1, 1, 1]} : vector<4x4x1x64xf32> to vector<1x1x1x64xf32>
    %189 = vector.shape_cast %188 : vector<1x1x1x64xf32> to vector<1x64xf32>
    %190 = vector.broadcast %189 : vector<1x64xf32> to vector<8x64xf32>
    %191 = arith.mulf %190, %118 : vector<8x64xf32>
    %192 = arith.addf %187, %191 : vector<8x64xf32>
    %193 = vector.extract_strided_slice %97 {offsets = [3, 3, 0, 0], sizes = [1, 1, 1, 64], strides = [1, 1, 1, 1]} : vector<4x4x1x64xf32> to vector<1x1x1x64xf32>
    %194 = vector.shape_cast %193 : vector<1x1x1x64xf32> to vector<1x64xf32>
    %195 = vector.broadcast %194 : vector<1x64xf32> to vector<8x64xf32>
    %196 = arith.mulf %195, %121 : vector<8x64xf32>
    %197 = arith.addf %192, %196 : vector<8x64xf32>
    %198 = tpu.concatenate %140, %159, %178, %197 in 1 : vector<8x64xf32>, vector<8x64xf32>, vector<8x64xf32>, vector<8x64xf32> -> vector<8x256xf32>
    %c0_36 = arith.constant 0 : index
    %c0_37 = arith.constant 0 : index
    %199 = vector.load %arg2[%c0_36, %c0_37] : memref<8x256xf32, #tpu.memory_space<vmem>>, vector<8x256xf32>
    %200 = arith.negf %198 : vector<8x256xf32>
    %201 = math.exp %200 : vector<8x256xf32>
    %cst_38 = arith.constant 1.000000e+00 : f32
    %202 = vector.broadcast %cst_38 : f32 to vector<8x256xf32>
    %203 = arith.addf %202, %201 : vector<8x256xf32>
    %204 = arith.divf %202, %203 : vector<8x256xf32>
    %cst_39 = arith.constant 1.000000e+00 : f32
    %205 = vector.broadcast %cst_39 : f32 to vector<8x256xf32>
    %206 = arith.addf %204, %205 : vector<8x256xf32>
    %207 = arith.mulf %199, %206 : vector<8x256xf32>
    %cst_40 = arith.constant dense<0.000000e+00> : vector<8xf32>
    %208 = vector.multi_reduction <add>, %207, %cst_40 [1] : vector<8x256xf32> to vector<8xf32>
    %209 = vector.shape_cast %208 : vector<8xf32> to vector<8x1xf32>
    %210 = arith.mulf %207, %207 : vector<8x256xf32>
    %cst_41 = arith.constant dense<0.000000e+00> : vector<8xf32>
    %211 = vector.multi_reduction <add>, %210, %cst_41 [1] : vector<8x256xf32> to vector<8xf32>
    %212 = vector.shape_cast %211 : vector<8xf32> to vector<8x1xf32>
    %c0_42 = arith.constant 0 : index
    %c0_43 = arith.constant 0 : index
    %213 = vector.load %arg7[%c0_42, %c0_43] : memref<8x8xf32, #tpu.memory_space<vmem>>, vector<8x8xf32>
    %cst_44 = arith.constant dense<0.000000e+00> : vector<8x1xf32>
    %214 = tpu.matmul %213, %209, %cst_44 {dimension_numbers = #tpu.dot_dimension_numbers<[1], [0], [0], [1], [0, 0, 1, 1], [], []>} : vector<8x8xf32>, vector<8x1xf32>, vector<8x1xf32> -> vector<8x1xf32>
    %c0_45 = arith.constant 0 : index
    %c0_46 = arith.constant 0 : index
    %215 = vector.load %arg7[%c0_45, %c0_46] : memref<8x8xf32, #tpu.memory_space<vmem>>, vector<8x8xf32>
    %cst_47 = arith.constant dense<0.000000e+00> : vector<8x1xf32>
    %216 = tpu.matmul %215, %212, %cst_47 {dimension_numbers = #tpu.dot_dimension_numbers<[1], [0], [0], [1], [0, 0, 1, 1], [], []>} : vector<8x8xf32>, vector<8x1xf32>, vector<8x1xf32> -> vector<8x1xf32>
    %cst_48 = arith.constant 0.001953125 : f32
    %217 = vector.broadcast %cst_48 : f32 to vector<8x1xf32>
    %218 = arith.mulf %214, %217 : vector<8x1xf32>
    %cst_49 = arith.constant 0.001953125 : f32
    %219 = vector.broadcast %cst_49 : f32 to vector<8x1xf32>
    %220 = arith.mulf %216, %219 : vector<8x1xf32>
    %221 = arith.mulf %218, %218 : vector<8x1xf32>
    %222 = arith.subf %220, %221 : vector<8x1xf32>
    %cst_50 = arith.constant 9.99999974E-6 : f32
    %223 = vector.broadcast %cst_50 : f32 to vector<8x1xf32>
    %224 = arith.addf %222, %223 : vector<8x1xf32>
    %225 = math.rsqrt %224 : vector<8x1xf32>
    %c0_51 = arith.constant 0 : index
    %c0_52 = arith.constant 0 : index
    %226 = vector.load %arg8[%c0_51, %c0_52] : memref<8x1xf32, #tpu.memory_space<vmem>>, vector<8x1xf32>
    %227 = arith.mulf %226, %225 : vector<8x1xf32>
    %c0_53 = arith.constant 0 : index
    %c0_54 = arith.constant 0 : index
    %228 = vector.load %arg9[%c0_53, %c0_54] : memref<8x1xf32, #tpu.memory_space<vmem>>, vector<8x1xf32>
    %229 = arith.mulf %218, %227 : vector<8x1xf32>
    %230 = arith.subf %228, %229 : vector<8x1xf32>
    %231 = vector.broadcast %227 : vector<8x1xf32> to vector<8x256xf32>
    %232 = arith.mulf %207, %231 : vector<8x256xf32>
    %233 = vector.broadcast %230 : vector<8x1xf32> to vector<8x256xf32>
    %234 = arith.addf %232, %233 : vector<8x256xf32>
    %cst_55 = arith.constant 0.000000e+00 : f32
    %235 = vector.broadcast %cst_55 : f32 to vector<8x256xf32>
    %236 = arith.maximumf %234, %235 : vector<8x256xf32>
    %c0_56 = arith.constant 0 : index
    %c0_57 = arith.constant 0 : index
    %237 = vector.load %arg10[%c0_56, %c0_57] : memref<8x256xf32, #tpu.memory_space<vmem>>, vector<8x256xf32>
    tpu.vector_store %arg10[%c0_56, %c0_57], %236 {strides = array<i32>} : memref<8x256xf32, #tpu.memory_space<vmem>>, vector<8x256xf32>,
    return
  }
  func.func @transform_0(%arg0: i32) -> (i32, i32, i32) {
    %c0_i32 = arith.constant 0 : i32
    %c0_i32_0 = arith.constant 0 : i32
    %c0_i32_1 = arith.constant 0 : i32
    %c0_i32_2 = arith.constant 0 : i32
    return %c0_i32, %c0_i32_0, %c0_i32_1 : i32, i32, i32
  }
  func.func @transform_1(%arg0: i32) -> (i32, i32) {
    %c0_i32 = arith.constant 0 : i32
    %c0_i32_0 = arith.constant 0 : i32
    %c0_i32_1 = arith.constant 0 : i32
    return %c0_i32, %c0_i32_0 : i32, i32
  }
  func.func @transform_2(%arg0: i32) -> (i32, i32) {
    %c0_i32 = arith.constant 0 : i32
    %c0_i32_0 = arith.constant 0 : i32
    %c0_i32_1 = arith.constant 0 : i32
    return %c0_i32, %c0_i32_0 : i32, i32
  }
  func.func @transform_3(%arg0: i32) -> (i32, i32) {
    %c0_i32 = arith.constant 0 : i32
    %c0_i32_0 = arith.constant 0 : i32
    %c0_i32_1 = arith.constant 0 : i32
    return %c0_i32, %c0_i32_0 : i32, i32
  }
  func.func @transform_4(%arg0: i32) -> (i32, i32, i32) {
    %c0_i32 = arith.constant 0 : i32
    %c0_i32_0 = arith.constant 0 : i32
    %c0_i32_1 = arith.constant 0 : i32
    %c0_i32_2 = arith.constant 0 : i32
    return %c0_i32, %c0_i32_0, %c0_i32_1 : i32, i32, i32
  }
  func.func @transform_5(%arg0: i32) -> (i32, i32, i32, i32) {
    %c0_i32 = arith.constant 0 : i32
    %c0_i32_0 = arith.constant 0 : i32
    %c0_i32_1 = arith.constant 0 : i32
    %c0_i32_2 = arith.constant 0 : i32
    %c0_i32_3 = arith.constant 0 : i32
    return %c0_i32, %c0_i32_0, %c0_i32_1, %c0_i32_2 : i32, i32, i32, i32
  }
  func.func @transform_6(%arg0: i32) -> (i32, i32) {
    %c0_i32 = arith.constant 0 : i32
    %c0_i32_0 = arith.constant 0 : i32
    %c0_i32_1 = arith.constant 0 : i32
    return %c0_i32, %c0_i32_0 : i32, i32
  }
  func.func @transform_7(%arg0: i32) -> (i32, i32) {
    %c0_i32 = arith.constant 0 : i32
    %c0_i32_0 = arith.constant 0 : i32
    %c0_i32_1 = arith.constant 0 : i32
    return %c0_i32, %c0_i32_0 : i32, i32
  }
  func.func @transform_8(%arg0: i32) -> (i32, i32) {
    %c0_i32 = arith.constant 0 : i32
    %c0_i32_0 = arith.constant 0 : i32
    %c0_i32_1 = arith.constant 0 : i32
    return %c0_i32, %c0_i32_0 : i32, i32
  }
  func.func @transform_9(%arg0: i32) -> (i32, i32) {
    %c0_i32 = arith.constant 0 : i32
    %c0_i32_0 = arith.constant 0 : i32
    %c0_i32_1 = arith.constant 0 : i32
    return %c0_i32, %c0_i32_0 : i32, i32
  }
}

</mosaic_0001>

<bundles_post_ra>
// kernel: tpu_custom_call.1
= control target key start
LH: loop header
LB: loop body
LE: loop exit
PB: predicated region body
PF: predicated region fallthrough
CT: control target
= control target key end

     0   :  { %14 = vsyncpa [#allocation3], 0  ;;  %s1133_s0 = inlined_call_operand.vmem [shape: f32[4,8,64], index: 0, kind: input, shape index: {}]   ;;  %s1134_s1 = inlined_call_operand.vmem [shape: f32[8,256], index: 1, kind: input, shape index: {}]   ;;  %s1135_s2 = inlined_call_operand.vmem [shape: bf16[72,8], index: 2, kind: input, shape index: {}]   ;;  %s1136_s3 = inlined_call_operand.vmem [shape: f32[8,1], index: 3, kind: input, shape index: {}]   ;;  %s1137_s4 = inlined_call_operand.vmem [shape: f32[9,1,64], index: 4, kind: input, shape index: {}]   ;;  %s1138_s5 = inlined_call_operand.vmem [shape: f32[4,4,1,64], index: 5, kind: input, shape index: {}]   ;;  %s1139_s6 = inlined_call_operand.hbm [shape: f32[8,8], index: 6, kind: input, shape index: {}]   ;;  %s1140_s7 = inlined_call_operand.vmem [shape: f32[8,1], index: 7, kind: input, shape index: {}]   ;;  %s1141_s8 = inlined_call_operand.vmem [shape: f32[8,1], index: 8, kind: input, shape index: {}]   ;;  %s1142_s9 = inlined_call_operand.hbm [shape: f32[8,256], index: 9, kind: output, shape index: {}]  }
   0x1   :  { %15 = vsyncpa [#allocation4], 0  ;;  %s875_s30 = smov [#allocation2]  }
   0x2   :  { %s34_s10 = sshll.u32 %s875_s30, 4  ;;  %s35_s10 = int_to_ptr.vmem [resolvable:$true] %s34_s10 }
   0x3   :  { %s839_s11 = scalar_lea.vmem %s35_s10, 128  ;;  %p844_p1 = scmp.lt.s32.totalorder %s35_s10, %s35_s10 }
   0x4   :  { %p840_p0 = scmp.ne.s32.totalorder %s35_s10, %s839_s11  ;;  %p845_p2 = scmp.lt.s32.totalorder %s839_s11, %s839_s11 }
   0x6   :  { %p846_p3 = por %p845_p2, %p844_p1 }
   0x8   :  { %p847_p4 = pnand %p846_p3, %p840_p0 }
   0xa   :  { %850 = shalt.err (!%p847_p4)
}
   0xb   :  { %37 = dma.hbm_to_vmem [thread:$0]  %s1139_s6, 128, %s35_s10, [#allocation3]  }
   0xc   :  { %871 = dma.done.wait [#allocation3], 128  }
   0xd   :  { %872 = vsyncadd [#allocation3], 4294967168  ;;  %v876_v0 = vmov 0.0   ;;  %vm877_vm0 = vmmov 0   ;;  %v46_v1 = vld [vmem:[%s1133_s0] sm:$0xff]  ;;  %v714_v2 = vld [vmem:[%s1133_s0 + $0x8] sm:$0xff] }
   0xe   :  { %766 = vmatprep.subr.bf16.mxu0 %v876_v0  ;;  %768 = vmatprep.mubr.msk.bf16.mxu0 %vm877_vm0, %v876_v0  ;;  %v715_v3 = vld [vmem:[%s1133_s0 + $0x10] sm:$0xff]  ;;  %v49_v4 = vmax.f32 %v46_v1, %v714_v2  ;;  %v716_v5 = vld [vmem:[%s1133_s0 + $0x18] sm:$0xff]  ;;  %vm105_vm1 = vcmask 1043456   ;;  %v816_v10 = vld [vmem:[%s1135_s2] sm:$0xff]   ;;  %vm89_vm2 = vcmask 64512   ;;  %v878_v15 = vmov 0  }
   0xf   :  { %798 = vmatprep.subr.bf16.mxu1 %v876_v0  ;;  %780 = vmatprep.mubr.msk.bf16.mxu1 %vm877_vm0, %v876_v0  ;;  %v54_v6 = vmax.f32 %v715_v3, %v716_v5  ;;  %v818_v11 = vld [vmem:[%s1135_s2 + $0x18] sm:$0xff]   ;;  %v817_v12 = vld [vmem:[%s1135_s2 + $0x8] sm:$0xff]   ;;  %v820_v13 = vld [vmem:[%s1135_s2 + $0x20] ss:$0 sps:$4 sm:$0xff]   ;;  %s879_s30 = smov 9   ;;  %s880_s10 = smov 8  }
  0x10   :  { %v819_v14 = vld [vmem:[%s1135_s2 + $0x10] sm:$0xff]   ;;  %814 = vset.pattern.permute.xlu0 %v878_v15  ;;  %815 = vset.pattern.permute.xlu1 %v878_v15  ;;  %s881_s2 = smov 7   ;;  %s882_s11 = smov 1   ;;  %v309_v36 = vld [vmem:[%s1136_s3] sm:$0xff]  ;;  %vm194_vm3 = vcmask 72704   ;;  %vm221_vm4 = vcmask 56320  }
  0x11   :  { %v55_v7 = vmax.f32 %v49_v4, %v54_v6  ;;  %s883_s12 = smov 121   ;;  %s884_s13 = smov 127   ;;  %v728_v39 = vld [vmem:[%s1137_s4 + $0x1] ss:$0 sm:$0xff]  ;;  %v727_v42 = vld [vmem:[%s1137_s4] ss:$0 sm:$0xff] }
  0x12   :  { %s885_s14 = smov 119   ;;  %s886_s15 = smov 120   ;;  %v729_v44 = vld [vmem:[%s1137_s4 + $0x2] ss:$0 sm:$0xff]  ;;  %vm235_vm5 = vcmask 7168   ;;  %vm257_vm6 = vcmask 515072  }
  0x13   :  { %v65_v8 = vpack.c.bf16 %v55_v7, %v55_v7  ;;  %v730_v47 = vld [vmem:[%s1137_s4 + $0x3] ss:$0 sm:$0xff]  ;;  %v731_v55 = vld [vmem:[%s1137_s4 + $0x4] ss:$0 sm:$0xff]  ;;  %v732_v57 = vld [vmem:[%s1137_s4 + $0x5] ss:$0 sm:$0xff] }
  0x14   :  { %vm271_vm7 = vcmask 465920   ;;  %vm285_vm8 = vcmask 457728   ;;  %v733_v1 = vld [vmem:[%s1137_s4 + $0x6] ss:$0 sm:$0xff]  ;;  %v734_v5 = vld [vmem:[%s1137_s4 + $0x7] ss:$0 sm:$0xff] }
  0x15   :  { %v107_v9 = vsel %vm105_vm1, %v65_v8, 0  ;;  %vm299_vm9 = vcmask 449536   ;;  %vm497_vm10 = vcmask 523264   ;;  %s888_s3 = smov [#allocation5]  }
  0x16   :  { %767 = vmatpush3.bf16.msra.mxu0 %v107_v9  ;;  %799 = vmatpush3.bf16.msra.mxu1 %v107_v9  ;;  %s705_s22 = sshll.u32 %s888_s3, 4  ;;  %s706_s22 = int_to_ptr.vmem [resolvable:$true] %s705_s22 }
  0x17   :  { %788 = vmatprep.subr.mxu1 %v876_v0  ;;  %p856_p6 = scmp.lt.s32.totalorder %s706_s22, %s706_s22 }
  0x19   :  { %769 = vmatmul.mubr.msk.bf16.vlgmr.msra.gmra.mxu0 %vm89_vm2, %v816_v10  ;;  %781 = vmatmul.mubr.msk.bf16.vlgmr.msra.gmra.mxu1 %vm89_vm2, %v818_v11  ;;  %v735_v11 = vld [vmem:[%s1137_s4 + $0x8] ss:$0 sm:$0xff]  ;;  %s887_s4 = smov 64  }
  0x1a   :  { %772 = vmatprep.mubr.msk.bf16.mxu0 %vm877_vm0, %v876_v0  ;;  %784 = vmatprep.mubr.msk.bf16.mxu1 %vm877_vm0, %v876_v0 }
  0x21   :  { %773 = vmatmul.mubr.msk.bf16.gmra.mxu0 %vm89_vm2, %v817_v12  ;;  %785 = vmatmul.mubr.msk.bf16.gmra.mxu1 %vm89_vm2, %v820_v13 }
  0x22   :  { %776 = vmatprep.mubr.msk.bf16.mxu0 %vm877_vm0, %v876_v0  ;;  %790 = vmatprep.mubr.msk.f32.mxu1 %vm877_vm0, %v876_v0 }
  0x29   :  { %777 = vmatmul.mubr.msk.bf16.gmra.mxu0 %vm89_vm2, %v819_v14 }
  0xd9   :  { %v143_v16 = vpop.f32.mrf.mxu0  ;;  %v167_v17 = vpop.f32.mrf.mxu1 }
  0xda   :  { %191 = vrot.lane.b32.xlu0 %v143_v16, %s879_s30 }
  0xdb   :  { %v770_v18 = vpop.f32.mrf.mxu0  ;;  %v782_v19 = vpop.f32.mrf.mxu1 }
  0xdd   :  { %v146_v20 = vpop.f32.mrf.mxu0  ;;  %v170_v21 = vpop.f32.mrf.mxu1 }
  0xde   :  { %205 = vrot.lane.b32.xlu0 %v146_v20, %s880_s10  ;;  %v740_v20 = vld [vmem:[%s1138_s5 + $0x4] ss:$0 sm:$0xff] }
  0xdf   :  { %v771_v22 = vpop.f32.mrf.mxu0  ;;  %v783_v23 = vpop.f32.mrf.mxu1 }
  0xe0   :  { %v741_v22 = vld [vmem:[%s1138_s5 + $0x5] ss:$0 sm:$0xff]  ;;  %v749_v23 = vld [vmem:[%s1138_s5 + $0xd] ss:$0 sm:$0xff] }
  0xe1   :  { %v151_v24 = vpop.f32.mrf.mxu0  ;;  %v175_v25 = vpop.f32.mrf.mxu1 }
  0xe2   :  { %218 = vrot.lane.b32.xlu1 %v151_v24, %s881_s2 }
  0xe3   :  { %v774_v26 = vpop.f32.mrf.mxu0  ;;  %v786_v27 = vpop.f32.mrf.mxu1 }
  0xe4   :  { %v742_v27 = vld [vmem:[%s1138_s5 + $0x6] ss:$0 sm:$0xff] }
  0xe5   :  { %v154_v28 = vpop.f32.mrf.mxu0  ;;  %v178_v29 = vpop.f32.mrf.mxu1 }
  0xe6   :  { %232 = vrot.lane.b32.xlu1 %v154_v28, %s882_s11  ;;  %v748_v29 = vld [vmem:[%s1138_s5 + $0xc] ss:$0 sm:$0xff] }
  0xe7   :  { %v775_v30 = vpop.f32.mrf.mxu0  ;;  %v787_v31 = vpop.f32.mrf.mxu1 }
  0xe9   :  { %v159_v32 = vpop.f32.mrf.mxu0 }
  0xea   :  { %268 = vrot.lane.b32.xlu1 %v167_v17, %s883_s12  ;;  %v251_v58 = vmul.f32 %v731_v55, %v159_v32  ;;  %v743_v32 = vld [vmem:[%s1138_s5 + $0x7] ss:$0 sm:$0xff]  ;;  %v745_v55 = vld [vmem:[%s1138_s5 + $0x9] ss:$0 sm:$0xff] }
  0xeb   :  { %v778_v33 = vpop.f32.mrf.mxu0 }
  0xed   :  { %v162_v34 = vpop.f32.mrf.mxu0 }
  0xee   :  { %254 = vrot.lane.b32.xlu0 %v162_v34, %s884_s13  ;;  %296 = vrot.lane.b32.xlu1 %v175_v25, %s885_s14 }
  0xef   :  { %v779_v35 = vpop.f32.mrf.mxu0 }
  0xf2   :  { %282 = vrot.lane.b32.xlu0 %v170_v21, %s886_s15 }
  0xf6   :  { %312 = vperm.xlu0 %814, %v309_v36  }
 0x14c   :  { %v192_v37 = vpop.permute.xlu0 %191 }
 0x14d   :  { %v195_v43 = vsel %vm194_vm3, 0.0, %v192_v37  ;;  %v750_v37 = vld [vmem:[%s1138_s5 + $0xe] ss:$0 sm:$0xff] }
 0x14e   :  { %v202_v48 = vmul.f32 %v727_v42, %v195_v43  ;;  %v737_v42 = vld [vmem:[%s1138_s5 + $0x1] ss:$0 sm:$0xff]  ;;  %v751_v43 = vld [vmem:[%s1138_s5 + $0xf] ss:$0 sm:$0xff] }
 0x150   :  { %v206_v38 = vpop.permute.xlu0 %205 }
 0x151   :  { %v208_v40 = vsel %vm89_vm2, 0.0, %v206_v38 }
 0x152   :  { %v215_v46 = vmul.f32 %v728_v39, %v208_v40 }
 0x154   :  { %v219_v41 = vpop.permute.xlu1 %218  ;;  %v216_v52 = vadd.f32 %v215_v46, %v202_v48 }
 0x155   :  { %v222_v45 = vsel %vm221_vm4, 0.0, %v219_v41 }
 0x156   :  { %v229_v49 = vmul.f32 %v729_v44, %v222_v45 }
 0x158   :  { %v233_v50 = vpop.permute.xlu1 %232  ;;  %v230_v54 = vadd.f32 %v229_v49, %v216_v52 }
 0x159   :  { %v236_v51 = vsel %vm235_vm5, 0.0, %v233_v50  ;;  %v736_v50 = vld [vmem:[%s1138_s5] ss:$0 sm:$0xff] }
 0x15a   :  { %v243_v53 = vmul.f32 %v730_v47, %v236_v51  ;;  %v744_v47 = vld [vmem:[%s1138_s5 + $0x8] ss:$0 sm:$0xff] }
 0x15c   :  { %v244_v56 = vadd.f32 %v243_v53, %v230_v54  ;;  %v269_v59 = vpop.permute.xlu1 %268  ;;  %v738_v54 = vld [vmem:[%s1138_s5 + $0x2] ss:$0 sm:$0xff] }
 0x15d   :  { %v272_v2 = vsel %vm271_vm7, %v269_v59, 0.0 }
 0x15e   :  { %v252_v62 = vadd.f32 %v251_v58, %v244_v56  ;;  %v279_v7 = vmul.f32 %v733_v1, %v272_v2 }
 0x160   :  { %v255_v60 = vpop.permute.xlu0 %254  ;;  %v297_v8 = vpop.permute.xlu1 %296 }
 0x161   :  { %v258_v61 = vsel %vm257_vm6, %v255_v60, 0.0  ;;  %v300_v12 = vsel %vm299_vm9, %v297_v8, 0.0 }
 0x162   :  { %v265_v63 = vmul.f32 %v732_v57, %v258_v61  ;;  %v307_v14 = vmul.f32 %v735_v11, %v300_v12  ;;  %v746_v61 = vld [vmem:[%s1138_s5 + $0xa] ss:$0 sm:$0xff] }
 0x164   :  { %v266_v3 = vadd.f32 %v265_v63, %v252_v62  ;;  %v283_v4 = vpop.permute.xlu0 %282  ;;  %v739_v63 = vld [vmem:[%s1138_s5 + $0x3] ss:$0 sm:$0xff] }
 0x165   :  { %v286_v6 = vsel %vm285_vm8, %v283_v4, 0.0 }
 0x166   :  { %v280_v9 = vadd.f32 %v279_v7, %v266_v3  ;;  %v293_v10 = vmul.f32 %v734_v5, %v286_v6  ;;  %v747_v5 = vld [vmem:[%s1138_s5 + $0xb] ss:$0 sm:$0xff] }
 0x168   :  { %v294_v13 = vadd.f32 %v293_v10, %v280_v9 }
 0x16a   :  { %v308_v15 = vadd.f32 %v307_v14, %v294_v13 }
 0x171   :  { %v313_v16 = vpop.permute.xlu0 %312 }
 0x172   :  { %v1035_v17 = vadd.f32 %v313_v16, %v308_v15 }
 0x174   :  { %349 = vrot.lane.b32.xlu0 %v1035_v17, %s884_s13  ;;  %337 = vrot.lane.b32.xlu1 %v1035_v17, %s880_s10  ;;  %v417_v35 = vmul.f32 %v742_v27, %v1035_v17  ;;  %v464_v39 = vmul.f32 %v748_v29, %v1035_v17  ;;  %v440_v2 = vmul.f32 %v745_v55, %v1035_v17  ;;  %v501_v29 = vld [vmem:[%s1134_s1 + $0x8] sm:$0xff] }
 0x175   :  { %v394_v10 = vmul.f32 %v739_v63, %v1035_v17 }
 0x178   :  { %361 = vrot.lane.b32.xlu0 %v1035_v17, %s885_s14  ;;  %345 = vrot.lane.b32.xlu1 %v1035_v17, %s881_s2 }
 0x17c   :  { %341 = vrot.lane.b32.xlu0 %v1035_v17, %s882_s11  ;;  %357 = vrot.lane.b32.xlu1 %v1035_v17, %s886_s15 }
 0x180   :  { %333 = vrot.lane.b32.xlu1 %v1035_v17, %s879_s30 }
 0x184   :  { %353 = vrot.lane.b32.xlu1 %v1035_v17, %s883_s12 }
 0x1e6   :  { %v350_v18 = vpop.permute.xlu0 %349  ;;  %v338_v19 = vpop.permute.xlu1 %337 }
 0x1e7   :  { %v340_v21 = vsel %vm89_vm2, 0.0, %v338_v19  ;;  %v352_v24 = vsel %vm257_vm6, %v350_v18, 0.0 }
 0x1e8   :  { %v402_v30 = vmul.f32 %v740_v20, %v340_v21  ;;  %v471_v33 = vmul.f32 %v749_v23, %v352_v24  ;;  %v425_v41 = vmul.f32 %v743_v32, %v352_v24  ;;  %v378_v58 = vmul.f32 %v737_v42, %v340_v21 }
 0x1ea   :  { %v362_v25 = vpop.permute.xlu0 %361  ;;  %v346_v26 = vpop.permute.xlu1 %345  ;;  %v472_v46 = vadd.f32 %v471_v33, %v464_v39 }
 0x1eb   :  { %v348_v28 = vsel %vm221_vm4, 0.0, %v346_v26  ;;  %v364_v44 = vsel %vm299_vm9, %v362_v25, 0.0  ;;  %v500_v26 = vld [vmem:[%s1134_s1] sm:$0xff] }
 0x1ec   :  { %v409_v31 = vmul.f32 %v741_v22, %v348_v28  ;;  %v487_v53 = vmul.f32 %v751_v43, %v364_v44 }
 0x1ee   :  { %v410_v34 = vadd.f32 %v409_v31, %v402_v30  ;;  %v342_v36 = vpop.permute.xlu0 %341  ;;  %v358_v38 = vpop.permute.xlu1 %357 }
 0x1ef   :  { %v360_v40 = vsel %vm285_vm8, %v358_v38, 0.0  ;;  %v344_v48 = vsel %vm235_vm5, 0.0, %v342_v36 }
 0x1f0   :  { %v418_v45 = vadd.f32 %v417_v35, %v410_v34  ;;  %v479_v49 = vmul.f32 %v750_v37, %v360_v40  ;;  %v433_v59 = vmul.f32 %v744_v47, %v344_v48  ;;  %v386_v1 = vmul.f32 %v738_v54, %v344_v48  ;;  %v526_v37 = vld [vmem:[#allocation2] sm:$0xff] }
 0x1f1   :  { %v456_v11 = vmul.f32 %v747_v5, %v360_v40 }
 0x1f2   :  { %v334_v51 = vpop.permute.xlu1 %333  ;;  %v426_v52 = vadd.f32 %v425_v41, %v418_v45  ;;  %v480_v56 = vadd.f32 %v479_v49, %v472_v46  ;;  %v441_v7 = vadd.f32 %v440_v2, %v433_v59  ;;  %v676_v49 = vld [vmem:[%s1140_s7] sm:$0xff]  ;;  %s851_s7 = scalar_lea.vmem %s706_s22, 256 }
 0x1f3   :  { %v336_v57 = vsel %vm194_vm3, 0.0, %v334_v51  ;;  %p852_p5 = scmp.ne.s32.totalorder %s706_s22, %s851_s7  ;;  %p857_p7 = scmp.lt.s32.totalorder %s851_s7, %s851_s7 }
 0x1f4   :  { %v371_v60 = vmul.f32 %v736_v50, %v336_v57  ;;  %490 = vrot.lane.b32.xlu0 %v426_v52, %s887_s4  ;;  %v488_v62 = vadd.f32 %v487_v53, %v480_v56 }
 0x1f5   :  { %p858_p8 = por %p857_p7, %p856_p6 }
 0x1f6   :  { %v379_v3 = vadd.f32 %v378_v58, %v371_v60  ;;  %v354_v4 = vpop.permute.xlu1 %353  ;;  %494 = vrot.lane.b32.xlu1 %v488_v62, %s887_s4 }
 0x1f7   :  { %v356_v6 = vsel %vm271_vm7, %v354_v4, 0.0  ;;  %p859_p9 = pnand %p858_p8, %p852_p5 }
 0x1f8   :  { %v387_v8 = vadd.f32 %v386_v1, %v379_v3  ;;  %v448_v9 = vmul.f32 %v746_v61, %v356_v6 }
 0x1fa   :  { %v449_v12 = vadd.f32 %v448_v9, %v441_v7  ;;  %v395_v13 = vadd.f32 %v394_v10, %v387_v8 }
 0x1fc   :  { %v457_v14 = vadd.f32 %v456_v11, %v449_v12 }
 0x266   :  { %v491_v15 = vpop.permute.xlu0 %490 }
 0x267   :  { %v498_v16 = vsel %vm497_vm10, %v395_v13, %v491_v15 }
 0x268   :  { %v752_v18 = vmul.f32 -1.442695, %v498_v16  ;;  %v495_v19 = vpop.permute.xlu1 %494 }
 0x269   :  { %v499_v20 = vsel %vm497_vm10, %v457_v14, %v495_v19 }
 0x26a   :  { %821 = vpow2.f32 %v752_v18  ;;  %v753_v21 = vmul.f32 -1.442695, %v499_v20 }
 0x26c   :  { %823 = vpow2.f32 %v753_v21 }
 0x277   :  { %v822_v22 = vpop.eup %821 }
 0x278   :  { %v508_v23 = vadd.f32 1.0, %v822_v22 }
 0x279   :  { %v824_v24 = vpop.eup %823 }
 0x27a   :  { %825 = vrcp.f32 %v508_v23  ;;  %v509_v25 = vadd.f32 1.0, %v824_v24 }
 0x27c   :  { %827 = vrcp.f32 %v509_v25 }
 0x287   :  { %v826_v17 = vpop.eup %825 }
 0x288   :  { %v514_v27 = vadd.f32 1.0, %v826_v17 }
 0x289   :  { %v828_v28 = vpop.eup %827 }
 0x28a   :  { %v515_v30 = vadd.f32 1.0, %v828_v28  ;;  %v516_v31 = vmul.f32 %v514_v27, %v500_v26 }
 0x28c   :  { %v517_v32 = vmul.f32 %v515_v30, %v501_v29  ;;  %v521_v34 = vmul.f32 %v516_v31, %v516_v31 }
 0x28e   :  { %v518_v33 = vadd.f32 %v517_v32, %v516_v31  ;;  %v522_v35 = vmul.f32 %v517_v32, %v517_v32 }
 0x290   :  { %519 = vadd.xlane.f32.xlu0 %v518_v33  ;;  %v523_v36 = vadd.f32 %v522_v35, %v521_v34 }
 0x292   :  { %524 = vadd.xlane.f32.xlu1 %v523_v36 }
 0x319   :  { %v520_v38 = vpop.xlane.xlu0 %519 }
 0x31a   :  { %789 = vmatpush3.msra.mxu1 %v520_v38 }
 0x31b   :  { %v525_v39 = vpop.xlane.xlu1 %524  ;;  %791 = vmatmul.mubr.msk.f32.vlgmr.msra.gmra.mxu1 %vm89_vm2, %v526_v37  ;;  %793 = vmatprep.subr.mxu1 %v876_v0 }
 0x31c   :  { %794 = vmatpush3.msra.mxu1 %v525_v39  ;;  %795 = vmatprep.mubr.msk.f32.mxu1 %vm877_vm0, %v876_v0  ;;  %v678_v0 = vld [vmem:[%s1141_s8] sm:$0xff] }
 0x31f   :  { %796 = vmatmul.mubr.msk.f32.vlgmr.msra.gmra.mxu1 %vm89_vm2, %v526_v37 }
 0x3db   :  { %v596_v40 = vpop.f32.mrf.mxu1 }
 0x3dc   :  { %v670_v41 = vmul.f32 0.001953125, %v596_v40 }
 0x3dd   :  { %v792_v42 = vpop.f32.mrf.mxu1 }
 0x3de   :  { %v672_v44 = vmul.f32 %v670_v41, %v670_v41 }
 0x3df   :  { %v666_v43 = vpop.f32.mrf.mxu1 }
 0x3e0   :  { %v671_v45 = vmul.f32 0.001953125, %v666_v43 }
 0x3e1   :  { %v797_v46 = vpop.f32.mrf.mxu1 }
 0x3e2   :  { %v673_v47 = vsub.f32 %v671_v45, %v672_v44 }
 0x3e4   :  { %v674_v48 = vadd.f32 1e-05, %v673_v47 }
 0x3e6   :  { %829 = vrsqrt.f32 %v674_v48 }
 0x3f3   :  { %v830_v50 = vpop.eup %829 }
 0x3f4   :  { %v677_v51 = vmul.f32 %v830_v50, %v676_v49 }
 0x3f6   :  { %683 = vperm.xlu0 %814, %v677_v51   ;;  %v679_v52 = vmul.f32 %v677_v51, %v670_v41 }
 0x3f8   :  { %v680_v53 = vsub.f32 %v678_v0, %v679_v52 }
 0x3fa   :  { %690 = vperm.xlu1 %815, %v680_v53  }
 0x471   :  { %v684_v54 = vpop.permute.xlu0 %683 }
 0x472   :  { %v686_v55 = vmul.f32 %v684_v54, %v516_v31  ;;  %v687_v56 = vmul.f32 %v684_v54, %v517_v32 }
 0x475   :  { %v691_v57 = vpop.permute.xlu1 %690 }
 0x476   :  { %v693_v58 = vadd.f32 %v691_v57, %v686_v55  ;;  %v694_v59 = vadd.f32 %v691_v57, %v687_v56 }
 0x478   :  { %v695_v60 = vmax.f32 %v693_v58, 0.0  ;;  %v696_v61 = vmax.f32 %v694_v59, 0.0 }
 0x47a   :  { %697 = vst [vmem:[#allocation5] sm:$0xff] %v695_v60  ;;  %698 = vst [vmem:[#allocation5 + $0x8] sm:$0xff] %v696_v61 }
 0x47b   :  { %862 = shalt.err (!%p859_p9)
}
 0x47c   :  { %708 = dma.vmem_to_hbm [thread:$0]  %s706_s22, 256, %s1142_s9, [#allocation4]  }
 0x47d   :  { %873 = dma.done.wait [#allocation4], 256  }
 0x47e   :  { %874 = vsyncadd [#allocation4], 4294967040 }
 0x47f   :  { %712 = vsyncpa [#allocation3], 1 }
 0x480   :  { %713 = vsyncpa [#allocation4], 1 }

</bundles_post_ra>
